<compile_context>
chip_gen: v7x
topology: tpu7x:2x2x1
jax: 0.10.0
libtpu: 0.0.40
codegen_flags: <defaults>
</compile_context>

<pallas_src>
import jax
import jax.numpy as jnp
from jax.experimental import pallas as pl
from jax.experimental.pallas import tpu as pltpu


_TARGET_BLOCK_BYTES = 2 * 1024 * 1024  # ~2 MiB per block (fits every gen's scoped VMEM)


# ----------------------------- kernels --------------------------------------

def _relu_kernel(x_ref, o_ref):
    x = x_ref[...]
    o_ref[...] = jnp.maximum(x, jnp.zeros_like(x))


def _pasu_softplus_kernel(x_ref, b_ref, o_ref):
    # x_ref: (TM, TC); b_ref: (TM, 2) with lane 0 = clamped beta, lane 1 = 1/beta
    # (both precomputed in the wrapper -> kernel is pure VPU + EUP elementwise).
    # TODO(synk): custom autograd `Softplus.apply` body is not given; we use the
    # standard parameterized softplus (1/beta)*log1p(exp(beta*x)) with beta
    # clamped by epsilon, in numerically stable form.
    compute_dtype = jnp.bfloat16 if x_ref.dtype == jnp.bfloat16 else jnp.float32
    x = x_ref[...].astype(compute_dtype)
    beta = b_ref[:, 0:1].astype(compute_dtype)       # (TM, 1), broadcasts over lanes
    inv_beta = b_ref[:, 1:2].astype(compute_dtype)   # (TM, 1)
    z = x * beta
    sp = jnp.maximum(z, jnp.zeros_like(z)) + jnp.log1p(jnp.exp(-jnp.abs(z)))
    o_ref[...] = (sp * inv_beta).astype(o_ref.dtype)


# ----------------------------- tiling ----------------------------------------

def _sublane_pack(dtype):
    # 8 for f32, 16 for bf16, 32 for int8/fp8.
    return max(8, 32 // jnp.dtype(dtype).itemsize)


def _round_down(v, mult):
    return max(mult, (v // mult) * mult)


def _pick_tiles(m, cols, dtype):
    """Pick (row_tile, col_tile) for a (m, cols) elementwise slab."""
    itemsize = jnp.dtype(dtype).itemsize
    pack = _sublane_pack(dtype)

    # Column split only when cols is a multiple of 128 (otherwise the block's
    # last dim must equal the full dim) and a pack-row block would blow budget.
    if cols % 128 == 0 and cols * pack * itemsize > _TARGET_BLOCK_BYTES:
        tm = min(pack, m)
        tc = min(cols, _round_down(_TARGET_BLOCK_BYTES // (pack * itemsize), 128))
        return tm, tc

    tc = cols
    if m <= pack:
        return m, tc                                  # full-dim row block: legal
    tm = _round_down(_TARGET_BLOCK_BYTES // max(1, cols * itemsize), pack)
    tm = min(tm, _round_down(m, pack))
    if m >= 2 * pack:
        # Keep >=2 row-grid steps so v7x's two TensorCores can share the work.
        tm = min(tm, _round_down(m // 2, pack))
    return max(tm, pack), tc


def _flatten_lane_dense(x):
    """Flatten a whole tensor to a (rows, k*128) lane-dense slab if possible."""
    total = x.size
    for lane in (1024, 512, 256, 128):
        if total % lane == 0:
            return x.reshape(total // lane, lane)
    return None


# ----------------------------- wrapper ---------------------------------------

def pasu_forward(x_nchw, beta, *, relu=True, epsilon=1e-5):
    """PaSU forward. x_nchw: (N, C, H, W), beta: (C,)."""
    n, c, h, w = x_nchw.shape
    m, cols = n * c, h * w

    if relu:
        # relu has no per-row structure: prefer whichever contiguous reshape is
        # lane-dense (multiple of 128 lanes).  No transposes either way.
        if cols % 128 == 0:
            x2d = x_nchw.reshape(m, cols)
        else:
            x2d = _flatten_lane_dense(x_nchw)
            if x2d is None:
                x2d = x_nchw.reshape(m, cols)         # masked stores; rare shapes only
        rows, lanes = x2d.shape
        tm, tc = _pick_tiles(rows, lanes, x2d.dtype)
        grid = (pl.cdiv(rows, tm), pl.cdiv(lanes, tc))

        out2d = pl.pallas_call(
            _relu_kernel,
            out_shape=jax.ShapeDtypeStruct((rows, lanes), x2d.dtype),
            grid_spec=pltpu.PrefetchScalarGridSpec(
                num_scalar_prefetch=0,
                grid=grid,
                in_specs=[pl.BlockSpec((tm, tc), lambda i, j: (i, j))],
                out_specs=pl.BlockSpec((tm, tc), lambda i, j: (i, j)),
            ),
            compiler_params=pltpu.CompilerParams(
                dimension_semantics=("parallel", "parallel")),
        )(x2d)
        return out2d.reshape(n, c, h, w)

    # ---- parameterized softplus path ----
    # Contiguous reshape (no transpose). Row r corresponds to (batch r // C,
    # channel r % C); lanes are the H*W spatial positions.
    x2d = x_nchw.reshape(m, cols)
    tm, tc = _pick_tiles(m, cols, x2d.dtype)
    grid = (pl.cdiv(m, tm), pl.cdiv(cols, tc))

    # Hoist all per-channel scalar math out of the kernel (tiny (C,) arrays),
    # then pack beta and 1/beta into one (m, 2) column pair.
    beta_safe = jnp.maximum(beta.astype(jnp.float32), epsilon)
    inv_beta = 1.0 / beta_safe
    bcols = jnp.stack([jnp.tile(beta_safe, n), jnp.tile(inv_beta, n)], axis=-1)  # (m, 2)

    out2d = pl.pallas_call(
        _pasu_softplus_kernel,
        out_shape=jax.ShapeDtypeStruct((m, cols), x2d.dtype),
        grid_spec=pltpu.PrefetchScalarGridSpec(
            num_scalar_prefetch=0,
            grid=grid,
            in_specs=[
                pl.BlockSpec((tm, tc), lambda i, j: (i, j)),
                pl.BlockSpec((tm, 2), lambda i, j: (i, 0)),
            ],
            out_specs=pl.BlockSpec((tm, tc), lambda i, j: (i, j)),
        ),
        compiler_params=pltpu.CompilerParams(
            dimension_semantics=("parallel", "parallel")),
    )(x2d, bcols)
    return out2d.reshape(n, c, h, w)


# ----------------------------- main ------------------------------------------

if __name__ == "__main__":
    key = jax.random.PRNGKey(0)
    N, C, H, W = 2, 4, 16, 16
    x = jax.random.normal(key, (N, C, H, W), dtype=jnp.float32)

    # Deterministic parameter init, matching PaSU.reset_parameters():
    # torch.nn.init.constant_(beta, init=100.0)
    features = C
    init = 100.0
    epsilon = 1e-5
    beta = jnp.full((features,), init, dtype=jnp.float32)

    # Branch 1: relu=True (module default)
    y_relu = jax.block_until_ready(pasu_forward(x, beta, relu=True, epsilon=epsilon))
    ref_relu = jnp.maximum(x, 0.0)
    assert jnp.allclose(y_relu, ref_relu, atol=1e-6), "relu branch mismatch"

    # Branch 2: relu=False (parameterized softplus path)
    y_sp = jax.block_until_ready(pasu_forward(x, beta, relu=False, epsilon=epsilon))
    b = jnp.maximum(beta, epsilon).reshape(1, C, 1, 1)
    z = x * b
    ref_sp = (jnp.maximum(z, 0.0) + jnp.log1p(jnp.exp(-jnp.abs(z)))) / b
    assert jnp.allclose(y_sp, ref_sp, atol=1e-5), "softplus branch mismatch"

    print("KERNEL_OK")
</pallas_src>

<mosaic_0001>
module attributes {stable_mosaic.version = 11 : i64} {
  func.func @_relu_kernel(%arg0: i32, %arg1: i32, %arg2: memref<8x256xf32, #tpu.memory_space<vmem>>, %arg3: memref<8x256xf32, #tpu.memory_space<vmem>>) attributes {dimension_semantics = [#tpu.dimension_semantics<parallel>, #tpu.dimension_semantics<parallel>], iteration_bounds = array<i64: 1, 1>, scalar_prefetch = 0 : i64, scratch_operands = 0 : i64, tpu.core_type = #tpu.core_type<tc>, window_params = [{transform_indices = @transform_0, window_bounds = array<i64: 8, 256>}, {transform_indices = @transform_1, window_bounds = array<i64: 8, 256>}]} {
    %c0 = arith.constant 0 : index
    %c0_0 = arith.constant 0 : index
    %0 = vector.load %arg2[%c0, %c0_0] : memref<8x256xf32, #tpu.memory_space<vmem>>, vector<8x256xf32>
    %cst = arith.constant 0.000000e+00 : f32
    %1 = vector.broadcast %cst : f32 to vector<8x256xf32>
    %2 = arith.maximumf %0, %1 : vector<8x256xf32>
    %c0_1 = arith.constant 0 : index
    %c0_2 = arith.constant 0 : index
    %3 = vector.load %arg3[%c0_1, %c0_2] : memref<8x256xf32, #tpu.memory_space<vmem>>, vector<8x256xf32>
    tpu.vector_store %arg3[%c0_1, %c0_2], %2 {strides = array<i32>} : memref<8x256xf32, #tpu.memory_space<vmem>>, vector<8x256xf32>,
    return
  }
  func.func @transform_0(%arg0: i32, %arg1: i32) -> (i32, i32) {
    %c0_i32 = arith.constant 0 : i32
    return %arg0, %arg1 : i32, i32
  }
  func.func @transform_1(%arg0: i32, %arg1: i32) -> (i32, i32) {
    %c0_i32 = arith.constant 0 : i32
    return %arg0, %arg1 : i32, i32
  }
}

</mosaic_0001>

<bundles_post_ra>
// kernel: tpu_custom_call.1
= control target key start
LH: loop header
LB: loop body
LE: loop exit
PB: predicated region body
PF: predicated region fallthrough
CT: control target
= control target key end

     0   :  { %6 = vsyncpa [#allocation3], 0  ;;  %s128_s0 = inlined_call_operand.hbm [shape: f32[8,256], index: 0, kind: input, shape index: {}]   ;;  %s129_s1 = inlined_call_operand.hbm [shape: f32[8,256], index: 1, kind: output, shape index: {}]  }
   0x1   :  { %7 = vsyncpa [#allocation4], 0  ;;  %s92_s6 = smov [#allocation2]   ;;  %s44_s10 = scalar_lea.hbm %s128_s0, 256 }
   0x2   :  { %s14_s7 = sshll.u32 %s92_s6, 4  ;;  %p45_p0 = scmp.ne.s32.totalorder %s128_s0, %s44_s10  ;;  %s15_s7 = int_to_ptr.vmem [resolvable:$true] %s14_s7 }
   0x3   :  { %p48_p1 = scmp.lt.u32.totalorder %s44_s10, %s128_s0 }
   0x5   :  { %p50_p2 = pnand %p48_p1, %p45_p0 }
   0x7   :  { %53 = shalt.err (!%p50_p2)
}
   0x8   :  { %s54_s15 = scalar_lea.vmem %s15_s7, 256  ;;  %p59_p4 = scmp.lt.s32.totalorder %s15_s7, %s15_s7 }
   0x9   :  { %p55_p3 = scmp.ne.s32.totalorder %s15_s7, %s54_s15  ;;  %p60_p5 = scmp.lt.s32.totalorder %s54_s15, %s54_s15 }
   0xb   :  { %p61_p6 = por %p60_p5, %p59_p4 }
   0xd   :  { %p62_p7 = pnand %p61_p6, %p55_p3 }
   0xf   :  { %65 = shalt.err (!%p62_p7)
}
  0x10   :  { %17 = dma.hbm_to_vmem [thread:$0]  %s128_s0, 256, %s15_s7, [#allocation3]  }
  0x11   :  { %88 = dma.done.wait [#allocation3], 256  }
  0x12   :  { %89 = vsyncadd [#allocation3], 4294967040  ;;  %s93_s18 = smov [#allocation5]   ;;  %v21_v0 = vld [vmem:[#allocation2] sm:$0xff]  ;;  %v22_v1 = vld [vmem:[#allocation2 + $0x8] sm:$0xff] }
  0x13   :  { %s33_s19 = sshll.u32 %s93_s18, 4  ;;  %v23_v2 = vmax.f32 %v21_v0, 0.0  ;;  %v24_v3 = vmax.f32 %v22_v1, 0.0  ;;  %s34_s19 = int_to_ptr.vmem [resolvable:$true] %s33_s19 }
  0x14   :  { %s66_s20 = scalar_lea.vmem %s34_s19, 256  ;;  %p71_p9 = scmp.lt.s32.totalorder %s34_s19, %s34_s19 }
  0x15   :  { %25 = vst [vmem:[#allocation5] sm:$0xff] %v23_v2  ;;  %26 = vst [vmem:[#allocation5 + $0x8] sm:$0xff] %v24_v3  ;;  %p67_p8 = scmp.ne.s32.totalorder %s34_s19, %s66_s20  ;;  %p72_p10 = scmp.lt.s32.totalorder %s66_s20, %s66_s20 }
  0x17   :  { %p73_p11 = por %p72_p10, %p71_p9 }
  0x19   :  { %p74_p12 = pnand %p73_p11, %p67_p8 }
  0x1b   :  { %77 = shalt.err (!%p74_p12)
}
  0x1c   :  { %s78_s22 = scalar_lea.hbm %s129_s1, 256 }
  0x1d   :  { %p79_p13 = scmp.ne.s32.totalorder %s129_s1, %s78_s22  ;;  %p82_p0 = scmp.lt.u32.totalorder %s78_s22, %s129_s1 }
  0x1f   :  { %p84_p1 = pnand %p82_p0, %p79_p13 }
  0x21   :  { %87 = shalt.err (!%p84_p1)
}
  0x22   :  { %36 = dma.vmem_to_hbm [thread:$0]  %s34_s19, 256, %s129_s1, [#allocation4]  }
  0x23   :  { %90 = dma.done.wait [#allocation4], 256  }
  0x24   :  { %91 = vsyncadd [#allocation4], 4294967040 }
  0x25   :  { %40 = vsyncpa [#allocation3], 1 }
  0x26   :  { %41 = vsyncpa [#allocation4], 1 }

</bundles_post_ra>
